<compile_context>
chip_gen: v7x
topology: tpu7x:2x2x1
jax: 0.10.0
libtpu: 0.0.40
codegen_flags: <defaults>
</compile_context>

<pallas_src>
import jax
import jax.numpy as jnp
from jax.experimental import pallas as pl
from jax.experimental.pallas import tpu as pltpu

_LANES = 128
_SUBLANES = 8


def _round_up(a, b):
    return ((a + b - 1) // b) * b


def _cdiv(a, b):
    return -(-a // b)


def _make_cls_loss_kernel(n_total, n_classes, block_rows, blocks_per_core, has_pad):
    samples_per_tile = block_rows * _LANES

    def kernel(xt_ref, y_ref, o_ref, acc_ref):
        # xt_ref : (C, block_rows, 128) logits, class-major, lane/sublane dense
        # y_ref  : (block_rows, 128) int32 class ids
        # o_ref  : (1, 1) f32 partial sum for this core chunk (SMEM)
        # acc_ref: (8, 128) f32 VMEM running accumulator (resident per chunk)
        r = pl.program_id(1)

        @pl.when(r == 0)
        def _init():
            acc_ref[...] = jnp.zeros_like(acc_ref)

        y = y_ref[...]

        # Unrolled over the small static class axis: pure VPU/EUP elementwise
        # work on dense (8,128) vregs; no (N,C) one-hot, no per-tile XLU work.
        x0 = xt_ref[0].astype(jnp.float32)
        xs = [x0]
        m = x0
        xy = jnp.where(y == 0, x0, jnp.float32(0.0))
        for ci in range(1, n_classes):
            xc = xt_ref[ci].astype(jnp.float32)
            xs.append(xc)
            m = jnp.maximum(m, xc)
            xy = jnp.where(y == ci, xc, xy)

        s = jnp.zeros_like(m)
        for xc in xs:
            s = s + jnp.exp(xc - m)

        # closed-form per-sample cross entropy: m + log(sum exp(x - m)) - x_y
        per_row = m + jnp.log(s) - xy  # (block_rows, 128)

        def tile_sum(v):
            # sublane-grouped partial sum: (R,128)->(R/8,8,128)->sum axis0->(8,128)
            # (leading-axis reduce = plain vector adds, no cross-lane work)
            return v.reshape(block_rows // _SUBLANES, _SUBLANES, _LANES).sum(axis=0)

        if has_pad:
            tile_idx = pl.program_id(0) * blocks_per_core + r
            tile_end = (tile_idx + 1) * samples_per_tile

            @pl.when(tile_end <= n_total)
            def _interior():  # no padding in this tile: zero masking cost
                acc_ref[...] += tile_sum(per_row)

            @pl.when(tile_end > n_total)
            def _boundary():  # tile overlaps the pad region: mask by global idx
                row_i = jax.lax.broadcasted_iota(jnp.int32, (block_rows, _LANES), 0)
                lane_j = jax.lax.broadcasted_iota(jnp.int32, (block_rows, _LANES), 1)
                g = tile_idx * samples_per_tile + row_i * _LANES + lane_j
                acc_ref[...] += tile_sum(
                    jnp.where(g < n_total, per_row, jnp.float32(0.0)))
        else:
            acc_ref[...] += tile_sum(per_row)

        @pl.when(r == pl.num_programs(1) - 1)
        def _finalize():
            # single cross-lane reduce per core chunk; scaling happens outside
            o_ref[0, 0] = jnp.sum(acc_ref[...])

    return kernel


def cls_loss(outputs, labels, *, block_rows=2048, core_splits=2):
    """Pallas equivalent of ClsLoss.forward(outputs, labels).

    outputs: (N, C) float logits (any float dtype; cast to f32 in-kernel)
    labels:  tuple (_, cls_id) with cls_id of shape (N,) integer class ids
    returns: scalar float32 loss = 0.1 * cross_entropy(outputs, cls_id)
    """
    pred_id = outputs
    _, cls_id = labels
    n, n_classes = pred_id.shape

    # --- tiling: rows of 128 samples, row-blocks multiple of 8 sublanes ------
    rows = _cdiv(n, _LANES)
    block_rows = _round_up(max(int(block_rows), _SUBLANES), _SUBLANES)
    num_cores = core_splits if rows >= core_splits * _SUBLANES else 1
    rows_per_core = _cdiv(rows, num_cores)
    block_rows = min(block_rows, _round_up(rows_per_core, _SUBLANES))
    blocks_per_core = _cdiv(rows_per_core, block_rows)
    rows_pad = num_cores * blocks_per_core * block_rows
    n_pad = rows_pad * _LANES
    has_pad = n_pad != n

    # --- restage: zero-pad, then class-major vreg-dense layout ---------------
    x = pred_id
    y = cls_id.reshape(-1).astype(jnp.int32)
    if has_pad:
        # zero logits / class-0 labels in the pad region; masked in-kernel
        x = jnp.pad(x, ((0, n_pad - n), (0, 0)))
        y = jnp.pad(y, ((0, n_pad - n),))

    xt = x.reshape(rows_pad, _LANES, n_classes).transpose(2, 0, 1)  # (C, rows, 128)
    y2 = y.reshape(rows_pad, _LANES)                                # (rows, 128)

    kernel = _make_cls_loss_kernel(n, n_classes, block_rows, blocks_per_core, has_pad)

    partials = pl.pallas_call(
        kernel,
        out_shape=jax.ShapeDtypeStruct((num_cores, 1), jnp.float32),
        grid=(num_cores, blocks_per_core),
        in_specs=[
            pl.BlockSpec((n_classes, block_rows, _LANES),
                         lambda c, r: (0, c * blocks_per_core + r, 0)),
            pl.BlockSpec((block_rows, _LANES),
                         lambda c, r: (c * blocks_per_core + r, 0)),
        ],
        out_specs=pl.BlockSpec((1, 1), lambda c, r: (c, 0),
                               memory_space=pltpu.MemorySpace.SMEM),
        scratch_shapes=[pltpu.VMEM((_SUBLANES, _LANES), jnp.float32)],
        compiler_params=pltpu.CompilerParams(
            dimension_semantics=("parallel", "arbitrary"),
            vmem_limit_bytes=32 * 1024 * 1024,
        ),
    )(xt, y2)

    # mean over the TRUE N and the 0.1 scale from ClsLoss.forward,
    # applied exactly once (outside the kernel so the per-core split is clean).
    return jnp.sum(partials) * jnp.float32(0.1 / n)


if __name__ == "__main__":
    key = jax.random.PRNGKey(0)
    k1, k2, k3, k4, k5 = jax.random.split(key, 5)

    # --- small case matching the module (3 classes) --------------------------
    N, C = 8, 3
    logits = jax.random.normal(k1, (N, C), dtype=jnp.float32)
    cls_id = jax.random.randint(k2, (N,), 0, C, dtype=jnp.int32)
    seg_gt = jax.random.randint(k3, (N,), 0, C, dtype=jnp.int32)  # unused label slot

    loss = jax.block_until_ready(cls_loss(logits, (seg_gt, cls_id)))
    logp = jax.nn.log_softmax(logits, axis=1)
    ref = 0.1 * -jnp.mean(jnp.take_along_axis(logp, cls_id[:, None], axis=1))
    assert jnp.allclose(loss, ref, atol=1e-5, rtol=1e-5), (loss, ref)

    # --- multi-block, dual-chunk path (grid over row blocks, masked padding) -
    N2 = 3000
    logits2 = jax.random.normal(k4, (N2, C), dtype=jnp.float32)
    cls_id2 = jax.random.randint(k5, (N2,), 0, C, dtype=jnp.int32)
    loss2 = jax.block_until_ready(cls_loss(logits2, (None, cls_id2), block_rows=8))
    logp2 = jax.nn.log_softmax(logits2, axis=1)
    ref2 = 0.1 * -jnp.mean(jnp.take_along_axis(logp2, cls_id2[:, None], axis=1))
    assert jnp.allclose(loss2, ref2, atol=1e-5, rtol=1e-5), (loss2, ref2)

    print("KERNEL_OK")
</pallas_src>

<mosaic_0001>
module attributes {stable_mosaic.version = 11 : i64} {
  func.func @kernel(%arg0: i32, %arg1: i32, %arg2: memref<3x8x128xf32, #tpu.memory_space<vmem>>, %arg3: memref<8x128xi32, #tpu.memory_space<vmem>>, %arg4: memref<1x1xf32, #tpu.memory_space<smem>>, %arg5: memref<8x128xf32, #tpu.memory_space<vmem>>) attributes {dimension_semantics = [#tpu.dimension_semantics<parallel>, #tpu.dimension_semantics<arbitrary>], iteration_bounds = array<i64: 1, 1>, scalar_prefetch = 0 : i64, scratch_operands = 1 : i64, tpu.core_type = #tpu.core_type<tc>, window_params = [{transform_indices = @transform_0, window_bounds = array<i64: 3, 8, 128>}, {transform_indices = @transform_1, window_bounds = array<i64: 8, 128>}, {transform_indices = @transform_2, window_bounds = array<i64: 1, 1>}]} {
    %c0_i32 = arith.constant 0 : i32
    %0 = arith.cmpi eq, %arg1, %c0_i32 : i32
    %1 = arith.extui %0 : i1 to i32
    %c0_i32_0 = arith.constant 0 : i32
    %2 = arith.cmpi ne, %1, %c0_i32_0 : i32
    scf.if %2 {
      %cst_18 = arith.constant 0.000000e+00 : f32
      %48 = vector.broadcast %cst_18 : f32 to vector<8x128xf32>
      %c0_19 = arith.constant 0 : index
      %c0_20 = arith.constant 0 : index
      %49 = vector.load %arg5[%c0_19, %c0_20] : memref<8x128xf32, #tpu.memory_space<vmem>>, vector<8x128xf32>
      tpu.vector_store %arg5[%c0_19, %c0_20], %48 {strides = array<i32>} : memref<8x128xf32, #tpu.memory_space<vmem>>, vector<8x128xf32>,
    } else {
    }
    %c0 = arith.constant 0 : index
    %c0_1 = arith.constant 0 : index
    %3 = vector.load %arg3[%c0, %c0_1] : memref<8x128xi32, #tpu.memory_space<vmem>>, vector<8x128xi32>
    %c0_2 = arith.constant 0 : index
    %c0_3 = arith.constant 0 : index
    %c0_4 = arith.constant 0 : index
    %4 = vector.load %arg2[%c0_2, %c0_3, %c0_4] : memref<3x8x128xf32, #tpu.memory_space<vmem>>, vector<1x8x128xf32>
    %5 = vector.shape_cast %4 : vector<1x8x128xf32> to vector<8x128xf32>
    %c0_i32_5 = arith.constant 0 : i32
    %6 = vector.broadcast %c0_i32_5 : i32 to vector<8x128xi32>
    %7 = arith.cmpi eq, %3, %6 : vector<8x128xi32>
    %cst = arith.constant 0.000000e+00 : f32
    %8 = vector.broadcast %cst : f32 to vector<8x128xf32>
    %9 = arith.select %7, %5, %8 : vector<8x128xi1>, vector<8x128xf32>
    %c1 = arith.constant 1 : index
    %c0_6 = arith.constant 0 : index
    %c0_7 = arith.constant 0 : index
    %10 = vector.load %arg2[%c1, %c0_6, %c0_7] : memref<3x8x128xf32, #tpu.memory_space<vmem>>, vector<1x8x128xf32>
    %11 = vector.shape_cast %10 : vector<1x8x128xf32> to vector<8x128xf32>
    %12 = arith.maximumf %5, %11 : vector<8x128xf32>
    %c1_i32 = arith.constant 1 : i32
    %13 = vector.broadcast %c1_i32 : i32 to vector<8x128xi32>
    %14 = arith.cmpi eq, %3, %13 : vector<8x128xi32>
    %15 = arith.select %14, %11, %9 : vector<8x128xi1>, vector<8x128xf32>
    %c2 = arith.constant 2 : index
    %c0_8 = arith.constant 0 : index
    %c0_9 = arith.constant 0 : index
    %16 = vector.load %arg2[%c2, %c0_8, %c0_9] : memref<3x8x128xf32, #tpu.memory_space<vmem>>, vector<1x8x128xf32>
    %17 = vector.shape_cast %16 : vector<1x8x128xf32> to vector<8x128xf32>
    %18 = arith.maximumf %12, %17 : vector<8x128xf32>
    %c2_i32 = arith.constant 2 : i32
    %19 = vector.broadcast %c2_i32 : i32 to vector<8x128xi32>
    %20 = arith.cmpi eq, %3, %19 : vector<8x128xi32>
    %21 = arith.select %20, %17, %15 : vector<8x128xi1>, vector<8x128xf32>
    %cst_10 = arith.constant 0.000000e+00 : f32
    %22 = vector.broadcast %cst_10 : f32 to vector<8x128xf32>
    %23 = arith.subf %5, %18 : vector<8x128xf32>
    %24 = math.exp %23 : vector<8x128xf32>
    %25 = arith.addf %22, %24 : vector<8x128xf32>
    %26 = arith.subf %11, %18 : vector<8x128xf32>
    %27 = math.exp %26 : vector<8x128xf32>
    %28 = arith.addf %25, %27 : vector<8x128xf32>
    %29 = arith.subf %17, %18 : vector<8x128xf32>
    %30 = math.exp %29 : vector<8x128xf32>
    %31 = arith.addf %28, %30 : vector<8x128xf32>
    %32 = math.log %31 : vector<8x128xf32>
    %33 = arith.addf %18, %32 : vector<8x128xf32>
    %34 = arith.subf %33, %21 : vector<8x128xf32>
    %c1_i32_11 = arith.constant 1 : i32
    %35 = arith.muli %arg0, %c1_i32_11 : i32
    %36 = arith.addi %35, %arg1 : i32
    %c1_i32_12 = arith.constant 1 : i32
    %37 = arith.addi %36, %c1_i32_12 : i32
    %c1024_i32 = arith.constant 1024 : i32
    %38 = arith.muli %37, %c1024_i32 : i32
    %c8_i32 = arith.constant 8 : i32
    %39 = arith.cmpi sle, %38, %c8_i32 : i32
    %40 = arith.extui %39 : i1 to i32
    %c0_i32_13 = arith.constant 0 : i32
    %41 = arith.cmpi ne, %40, %c0_i32_13 : i32
    scf.if %41 {
      %c0_18 = arith.constant 0 : index
      %c0_19 = arith.constant 0 : index
      %48 = vector.load %arg5[%c0_18, %c0_19] : memref<8x128xf32, #tpu.memory_space<vmem>>, vector<8x128xf32>
      %49 = vector.shape_cast %34 : vector<8x128xf32> to vector<1x8x128xf32>
      %cst_20 = arith.constant dense<0.000000e+00> : vector<8x128xf32>
      %50 = vector.multi_reduction <add>, %49, %cst_20 [0] : vector<1x8x128xf32> to vector<8x128xf32>
      %51 = arith.addf %48, %50 : vector<8x128xf32>
      %c0_21 = arith.constant 0 : index
      %c0_22 = arith.constant 0 : index
      %52 = vector.load %arg5[%c0_21, %c0_22] : memref<8x128xf32, #tpu.memory_space<vmem>>, vector<8x128xf32>
      tpu.vector_store %arg5[%c0_21, %c0_22], %51 {strides = array<i32>} : memref<8x128xf32, #tpu.memory_space<vmem>>, vector<8x128xf32>,
    } else {
    }
    %c8_i32_14 = arith.constant 8 : i32
    %42 = arith.cmpi sgt, %38, %c8_i32_14 : i32
    %43 = arith.extui %42 : i1 to i32
    %c0_i32_15 = arith.constant 0 : i32
    %44 = arith.cmpi ne, %43, %c0_i32_15 : i32
    scf.if %44 {
      %48 = tpu.iota {dimensions = array<i32: 0>} : vector<8x128xi32>
      %49 = tpu.iota {dimensions = array<i32: 1>} : vector<8x128xi32>
      %c1024_i32_18 = arith.constant 1024 : i32
      %50 = arith.muli %36, %c1024_i32_18 : i32
      %c128_i32 = arith.constant 128 : i32
      %51 = vector.broadcast %c128_i32 : i32 to vector<8x128xi32>
      %52 = arith.muli %48, %51 : vector<8x128xi32>
      %53 = vector.broadcast %50 : i32 to vector<8x128xi32>
      %54 = arith.addi %53, %52 : vector<8x128xi32>
      %55 = arith.addi %54, %49 : vector<8x128xi32>
      %c0_19 = arith.constant 0 : index
      %c0_20 = arith.constant 0 : index
      %56 = vector.load %arg5[%c0_19, %c0_20] : memref<8x128xf32, #tpu.memory_space<vmem>>, vector<8x128xf32>
      %c8_i32_21 = arith.constant 8 : i32
      %57 = vector.broadcast %c8_i32_21 : i32 to vector<8x128xi32>
      %58 = arith.cmpi slt, %55, %57 : vector<8x128xi32>
      %cst_22 = arith.constant 0.000000e+00 : f32
      %59 = vector.broadcast %cst_22 : f32 to vector<8x128xf32>
      %60 = arith.select %58, %34, %59 : vector<8x128xi1>, vector<8x128xf32>
      %61 = vector.shape_cast %60 : vector<8x128xf32> to vector<1x8x128xf32>
      %cst_23 = arith.constant dense<0.000000e+00> : vector<8x128xf32>
      %62 = vector.multi_reduction <add>, %61, %cst_23 [0] : vector<1x8x128xf32> to vector<8x128xf32>
      %63 = arith.addf %56, %62 : vector<8x128xf32>
      %c0_24 = arith.constant 0 : index
      %c0_25 = arith.constant 0 : index
      %64 = vector.load %arg5[%c0_24, %c0_25] : memref<8x128xf32, #tpu.memory_space<vmem>>, vector<8x128xf32>
      tpu.vector_store %arg5[%c0_24, %c0_25], %63 {strides = array<i32>} : memref<8x128xf32, #tpu.memory_space<vmem>>, vector<8x128xf32>,
    } else {
    }
    %c0_i32_16 = arith.constant 0 : i32
    %45 = arith.cmpi eq, %arg1, %c0_i32_16 : i32
    %46 = arith.extui %45 : i1 to i32
    %c0_i32_17 = arith.constant 0 : i32
    %47 = arith.cmpi ne, %46, %c0_i32_17 : i32
    scf.if %47 {
      %c0_18 = arith.constant 0 : index
      %c0_19 = arith.constant 0 : index
      %48 = vector.load %arg5[%c0_18, %c0_19] : memref<8x128xf32, #tpu.memory_space<vmem>>, vector<8x128xf32>
      %49 = vector.shape_cast %48 : vector<8x128xf32> to vector<1x8x128xf32>
      %cst_20 = arith.constant dense<0.000000e+00> : vector<1xf32>
      %50 = vector.multi_reduction <add>, %49, %cst_20 [1, 2] : vector<1x8x128xf32> to vector<1xf32>
      %51 = vector.shape_cast %50 : vector<1xf32> to vector<1x1x1xf32>
      %52 = vector.extract %51[0, 0, 0] : f32 from vector<1x1x1xf32>
      %c0_21 = arith.constant 0 : index
      %c0_22 = arith.constant 0 : index
      %53 = memref.load %arg4[%c0_21, %c0_22] : memref<1x1xf32, #tpu.memory_space<smem>>
      memref.store %52, %arg4[%c0_21, %c0_22] : memref<1x1xf32, #tpu.memory_space<smem>>
    } else {
    }
    return
  }
  func.func @transform_0(%arg0: i32, %arg1: i32) -> (i32, i32, i32) {
    %c1_i32 = arith.constant 1 : i32
    %0 = arith.muli %arg0, %c1_i32 : i32
    %1 = arith.addi %0, %arg1 : i32
    %c0_i32 = arith.constant 0 : i32
    %c0_i32_0 = arith.constant 0 : i32
    %c0_i32_1 = arith.constant 0 : i32
    return %c0_i32, %1, %c0_i32_0 : i32, i32, i32
  }
  func.func @transform_1(%arg0: i32, %arg1: i32) -> (i32, i32) {
    %c1_i32 = arith.constant 1 : i32
    %0 = arith.muli %arg0, %c1_i32 : i32
    %1 = arith.addi %0, %arg1 : i32
    %c0_i32 = arith.constant 0 : i32
    %c0_i32_0 = arith.constant 0 : i32
    return %1, %c0_i32 : i32, i32
  }
  func.func @transform_2(%arg0: i32, %arg1: i32) -> (i32, i32) {
    %c0_i32 = arith.constant 0 : i32
    %c0_i32_0 = arith.constant 0 : i32
    return %arg0, %c0_i32 : i32, i32
  }
}

</mosaic_0001>

<bundles_post_ra>
// kernel: tpu_custom_call.1
= control target key start
LH: loop header
LB: loop body
LE: loop exit
PB: predicated region body
PF: predicated region fallthrough
CT: control target
= control target key end

     0   :  { %7 = vsyncpa [#allocation4], 0  ;;  %s272_s0 = inlined_call_operand.hbm [shape: f32[3,8,128], index: 0, kind: input, shape index: {}]   ;;  %s273_s1 = inlined_call_operand.hbm [shape: s32[8,128], index: 1, kind: input, shape index: {}]   ;;  %s274_s2 = inlined_call_operand.hbm [shape: f32[1,1], index: 2, kind: output, shape index: {}]  }
   0x1   :  { %8 = vsyncpa [#allocation7], 0 }
   0x2   :  { %9 = vsyncpa [#allocation5], 0  ;;  %s216_s9 = smov [#allocation3]   ;;  %s156_s13 = scalar_lea.hbm %s272_s0, 384 }
   0x3   :  { %s18_s10 = sshll.u32 %s216_s9, 4  ;;  %p157_p0 = scmp.ne.s32.totalorder %s272_s0, %s156_s13  ;;  %s19_s10 = int_to_ptr.vmem [resolvable:$true] %s18_s10 }
   0x4   :  { %p160_p1 = scmp.lt.u32.totalorder %s156_s13, %s272_s0 }
   0x6   :  { %p162_p2 = pnand %p160_p1, %p157_p0 }
   0x8   :  { %165 = shalt.err (!%p162_p2)
}
   0x9   :  { %s166_s18 = scalar_lea.vmem %s19_s10, 384  ;;  %p171_p4 = scmp.lt.s32.totalorder %s19_s10, %s19_s10 }
   0xa   :  { %p167_p3 = scmp.ne.s32.totalorder %s19_s10, %s166_s18  ;;  %p172_p5 = scmp.lt.s32.totalorder %s166_s18, %s166_s18 }
   0xc   :  { %p173_p6 = por %p172_p5, %p171_p4 }
   0xe   :  { %p174_p7 = pnand %p173_p6, %p167_p3 }
  0x10   :  { %177 = shalt.err (!%p174_p7)
}
  0x11   :  { %s217_s19 = smov 128   ;;  %s218_s20 = smov 8  }
  0x12   :  { %24 = dma.hbm_to_vmem [thread:$0]  %s272_s0, 384, %s19_s10, [#allocation4], %s217_s19, %s217_s19, %s218_s20  }
  0x13   :  { %s219_s23 = smov [#allocation6]   ;;  %s178_s27 = scalar_lea.hbm %s273_s1, 128 }
  0x14   :  { %s34_s24 = sshll.u32 %s219_s23, 4  ;;  %p179_p8 = scmp.ne.s32.totalorder %s273_s1, %s178_s27  ;;  %s35_s24 = int_to_ptr.vmem [resolvable:$true] %s34_s24 }
  0x15   :  { %p182_p9 = scmp.lt.u32.totalorder %s178_s27, %s273_s1 }
  0x17   :  { %p184_p10 = pnand %p182_p9, %p179_p8 }
  0x19   :  { %187 = shalt.err (!%p184_p10)
}
  0x1a   :  { %s188_s4 = scalar_lea.vmem %s35_s24, 128  ;;  %p193_p12 = scmp.lt.s32.totalorder %s35_s24, %s35_s24 }
  0x1b   :  { %p189_p11 = scmp.ne.s32.totalorder %s35_s24, %s188_s4  ;;  %p194_p13 = scmp.lt.s32.totalorder %s188_s4, %s188_s4 }
  0x1d   :  { %p195_p0 = por %p194_p13, %p193_p12 }
  0x1f   :  { %p196_p1 = pnand %p195_p0, %p189_p11 }
  0x21   :  { %199 = shalt.err (!%p196_p1)
}
  0x22   :  { %37 = dma.hbm_to_vmem [thread:$0]  %s273_s1, 128, %s35_s24, [#allocation7]  }
  0x23   :  { %210 = dma.done.wait [#allocation4], 384  }
  0x24   :  { %211 = vsyncadd [#allocation4], 4294966912 }
  0x25   :  { %212 = dma.done.wait [#allocation7], 128  }
  0x26   :  { %213 = vsyncadd [#allocation7], 4294967168  ;;  %v52_v0 = vld [vmem:[#allocation3] sm:$0xff]  ;;  %v56_v1 = vld [vmem:[#allocation3 + $0x8] sm:$0xff]  ;;  %v96_v16 = vlaneseq  ;;  %s200_s8 = scalar_lea.hbm %s274_s2, 16 }
  0x27   :  { %v57_v2 = vmax.f32 %v52_v0, %v56_v1  ;;  %v61_v3 = vld [vmem:[#allocation3 + $0x10] sm:$0xff]  ;;  %v51_v17 = vld [vmem:[#allocation6] sm:$0xff]  ;;  %p201_p2 = scmp.ne.s32.totalorder %s274_s2, %s200_s8  ;;  %p204_p3 = scmp.lt.u32.totalorder %s200_s8, %s274_s2 }
  0x28   :  { %v97_v18 = vshrl.u32 %v96_v16, 7  ;;  %vm53_vm0 = vcmp.eq.s32.totalorder %v51_v17, 0  ;;  %vm58_vm1 = vcmp.eq.s32.totalorder %v51_v17, 1  ;;  %v99_v20 = vand.u32 127, %v96_v16 }
  0x29   :  { %v62_v4 = vmax.f32 %v57_v2, %v61_v3  ;;  %v54_v19 = vsel %vm53_vm0, %v52_v0, 0.0  ;;  %vm63_vm2 = vcmp.eq.s32.totalorder %v51_v17, 2  ;;  %p206_p4 = pnand %p204_p3, %p201_p2 }
  0x2a   :  { %v101_v21 = vmul.u32 128, %v97_v18  ;;  %v59_v22 = vsel %vm58_vm1, %v56_v1, %v54_v19 }
  0x2b   :  { %v65_v5 = vsub.f32 %v52_v0, %v62_v4  ;;  %v69_v6 = vsub.f32 %v56_v1, %v62_v4  ;;  %v73_v7 = vsub.f32 %v61_v3, %v62_v4  ;;  %v64_v26 = vsel %vm63_vm2, %v61_v3, %v59_v22 }
  0x2c   :  { %v104_v24 = vadd.s32 %v101_v21, %v99_v20 }
  0x2d   :  { %v66_v8 = vmul.f32 1.442695, %v65_v5  ;;  %v70_v9 = vmul.f32 1.442695, %v69_v6  ;;  %v74_v10 = vmul.f32 1.442695, %v73_v7 }
  0x2e   :  { %vm106_vm3 = vcmp.lt.s32.totalorder %v104_v24, 8 }
  0x2f   :  { %148 = vpow2.f32 %v66_v8 }
  0x30   :  { %150 = vpow2.f32 %v70_v9 }
  0x31   :  { %152 = vpow2.f32 %v74_v10 }
  0x39   :  { %v149_v11 = vpop.eup %148 }
  0x3a   :  { %v151_v12 = vpop.eup %150 }
  0x3b   :  { %v153_v13 = vpop.eup %152  ;;  %v72_v14 = vadd.f32 %v151_v12, %v149_v11 }
  0x3d   :  { %v76_v15 = vadd.f32 %v153_v13, %v72_v14 }
  0x3f   :  { %154 = vlog2.f32 %v76_v15 }
  0x49   :  { %v155_v23 = vpop.eup %154 }
  0x4a   :  { %v78_v25 = vmul.f32 0.6931472, %v155_v23 }
  0x4c   :  { %v79_v27 = vadd.f32 %v78_v25, %v62_v4 }
  0x4e   :  { %v80_v28 = vsub.f32 %v79_v27, %v64_v26 }
  0x50   :  { %v107_v29 = vsel %vm106_vm3, %v80_v28, 0.0 }
  0x51   :  { %115 = vadd.xlane.f32.xlu0 %v107_v29 }
  0xde   :  { %v116_v30 = vpop.xlane.xlu0 %115 }
  0xdf   :  { %v117_v31 = vrot.slane %v116_v30, 4 }
  0xe1   :  { %v118_v32 = vadd.f32 %v117_v31, %v116_v30 }
  0xe3   :  { %v119_v33 = vrot.slane %v118_v32, 2 }
  0xe5   :  { %v120_v34 = vadd.f32 %v119_v33, %v118_v32 }
  0xe7   :  { %v121_v35 = vrot.slane %v120_v34, 1 }
  0xe9   :  { %v122_v36 = vadd.f32 %v121_v35, %v120_v34 }
  0xeb   :  { %141 = vpush %v122_v36 }
 0x11c   :  { %s142_s1 = spop %141 }
 0x11d   :  { %125 = sst [smem:[#allocation8]] %s142_s1 }
 0x11e   :  { %209 = shalt.err (!%p206_p4)
}
 0x11f   :  { %s220_s13 = smov [#allocation8]  }
 0x120   :  { %133 = dma.smem_to_hbm %s220_s13, 16, %s274_s2, [#allocation5]  }
 0x121   :  { %214 = dma.done.wait [#allocation5], 16  }
 0x122   :  { %215 = vsyncadd [#allocation5], 4294967280 }
 0x123   :  { %137 = sfence }
 0x124   :  { %138 = vsyncpa [#allocation4], 1 }
 0x125   :  { %139 = vsyncpa [#allocation7], 1 }
 0x126   :  { %140 = vsyncpa [#allocation5], 1 }

</bundles_post_ra>
